<compile_context>
chip_gen: v5e
topology: v5e:2x2
jax: 0.10.0
libtpu: 0.0.40
codegen_flags: <defaults>
</compile_context>

<pallas_src>
import jax
import jax.numpy as jnp
from jax.experimental import pallas as pl
from jax.experimental.pallas import tpu as pltpu


def _importance_mul_kernel(x_ref, o_ref):
    # x_ref / o_ref: (1, C, T) tile — C on sublanes, T spatial positions on lanes.
    x = x_ref[...]                                                      # I/O dtype
    # Channel mean accumulated in f32 (cross-sublane reduce on the XLU).
    attention = jnp.mean(x, axis=1, keepdims=True, dtype=jnp.float32)   # (1, 1, T)
    importance_map = jax.nn.sigmoid(attention)                          # f32, EUP
    # Cast the (tiny) map once and multiply in the I/O dtype; broadcast along C.
    o_ref[...] = (x * importance_map.astype(x.dtype)).astype(o_ref.dtype)


def _choose_hw_tile(C, HW, itemsize, budget_bytes=20 * 1024 * 1024):
    """Lane-dense spatial tile (multiple of 128) keeping the double-buffered
    in+out working set (~4 live tiles) under `budget_bytes` (safe for the
    32 MiB scoped-VMEM limit on v5e/v6e/v7x)."""
    hw_pad = -(-HW // 128) * 128
    max_by_vmem = budget_bytes // (4 * C * itemsize)
    tile = max(128, (max_by_vmem // 128) * 128)
    return int(min(tile, 2048, hw_pad))


def mymodel2_forward(x, training: bool = True):
    """Forward pass of MyModel2. x: [B, C, H, W] (NCHW, matching PyTorch)."""
    if not training:
        return x

    B, C, H, W = x.shape
    HW = H * W
    x2 = x.reshape(B, C, HW)        # free reshape; spatial axis becomes lane-dense

    hw_tile = _choose_hw_tile(C, HW, jnp.dtype(x.dtype).itemsize)
    n_spatial = pl.cdiv(HW, hw_tile)   # partial last tile is masked by Pallas

    out2 = pl.pallas_call(
        _importance_mul_kernel,
        out_shape=jax.ShapeDtypeStruct((B, C, HW), x.dtype),
        grid_spec=pltpu.PrefetchScalarGridSpec(
            num_scalar_prefetch=0,
            grid=(B, n_spatial),
            in_specs=[pl.BlockSpec((1, C, hw_tile), lambda b, s: (b, 0, s))],
            out_specs=pl.BlockSpec((1, C, hw_tile), lambda b, s: (b, 0, s)),
        ),
        compiler_params=pltpu.CompilerParams(
            dimension_semantics=("parallel", "parallel"),
            vmem_limit_bytes=32 * 1024 * 1024,
        ),
    )(x2)
    return out2.reshape(B, C, H, W)


def _reference(x, training: bool = True):
    if not training:
        return x
    attention = jnp.mean(x, axis=1, keepdims=True)
    importance_map = jax.nn.sigmoid(attention)
    return x * importance_map


if __name__ == "__main__":
    key = jax.random.PRNGKey(0)

    # --- f32, divisible spatial extent ---
    B, C, H, W = 2, 4, 16, 16
    x = jax.random.normal(key, (B, C, H, W), dtype=jnp.float32)

    out_train = jax.block_until_ready(mymodel2_forward(x, training=True))
    out_eval = jax.block_until_ready(mymodel2_forward(x, training=False))

    ref_train = _reference(x, training=True)
    assert out_train.shape == x.shape
    assert out_train.dtype == x.dtype
    assert jnp.allclose(out_train, ref_train, atol=1e-6, rtol=1e-6)
    assert jnp.array_equal(out_eval, x)

    # --- bf16, non-multiple-of-128 spatial extent (14x14 -> partial tile) ---
    key2 = jax.random.PRNGKey(0)
    xb = jax.random.normal(key2, (2, 8, 14, 14), dtype=jnp.bfloat16)
    out_b = jax.block_until_ready(mymodel2_forward(xb, training=True))
    ref_b = _reference(xb.astype(jnp.float32), training=True)
    assert out_b.shape == xb.shape and out_b.dtype == xb.dtype
    assert jnp.allclose(out_b.astype(jnp.float32), ref_b, atol=6e-2, rtol=6e-2)

    print("KERNEL_OK")
</pallas_src>

<mosaic_0001>
module attributes {stable_mosaic.version = 11 : i64} {
  func.func @_importance_mul_kernel(%arg0: i32, %arg1: i32, %arg2: memref<1x4x256xf32, #tpu.memory_space<vmem>>, %arg3: memref<1x4x256xf32, #tpu.memory_space<vmem>>) attributes {dimension_semantics = [#tpu.dimension_semantics<parallel>, #tpu.dimension_semantics<parallel>], iteration_bounds = array<i64: 2, 1>, scalar_prefetch = 0 : i64, scratch_operands = 0 : i64, tpu.core_type = #tpu.core_type<tc>, window_params = [{transform_indices = @transform_0, window_bounds = array<i64: 1, 4, 256>}, {transform_indices = @transform_1, window_bounds = array<i64: 1, 4, 256>}]} {
    %c0 = arith.constant 0 : index
    %c0_0 = arith.constant 0 : index
    %c0_1 = arith.constant 0 : index
    %0 = vector.load %arg2[%c0, %c0_0, %c0_1] : memref<1x4x256xf32, #tpu.memory_space<vmem>>, vector<1x4x256xf32>
    %cst = arith.constant dense<0.000000e+00> : vector<1x256xf32>
    %1 = vector.multi_reduction <add>, %0, %cst [1] : vector<1x4x256xf32> to vector<1x256xf32>
    %2 = vector.shape_cast %1 : vector<1x256xf32> to vector<1x1x256xf32>
    %cst_2 = arith.constant 4.000000e+00 : f32
    %3 = vector.broadcast %cst_2 : f32 to vector<1x1x256xf32>
    %4 = arith.divf %2, %3 : vector<1x1x256xf32>
    %5 = arith.negf %4 : vector<1x1x256xf32>
    %6 = math.exp %5 : vector<1x1x256xf32>
    %cst_3 = arith.constant 1.000000e+00 : f32
    %7 = vector.broadcast %cst_3 : f32 to vector<1x1x256xf32>
    %8 = arith.addf %7, %6 : vector<1x1x256xf32>
    %9 = arith.divf %7, %8 : vector<1x1x256xf32>
    %10 = vector.broadcast %9 : vector<1x1x256xf32> to vector<1x4x256xf32>
    %11 = arith.mulf %0, %10 : vector<1x4x256xf32>
    %c0_4 = arith.constant 0 : index
    %c0_5 = arith.constant 0 : index
    %c0_6 = arith.constant 0 : index
    %12 = vector.load %arg3[%c0_4, %c0_5, %c0_6] : memref<1x4x256xf32, #tpu.memory_space<vmem>>, vector<1x4x256xf32>
    tpu.vector_store %arg3[%c0_4, %c0_5, %c0_6], %11 {strides = array<i32>} : memref<1x4x256xf32, #tpu.memory_space<vmem>>, vector<1x4x256xf32>,
    return
  }
  func.func @transform_0(%arg0: i32, %arg1: i32) -> (i32, i32, i32) {
    %c0_i32 = arith.constant 0 : i32
    %c0_i32_0 = arith.constant 0 : i32
    return %arg0, %c0_i32, %arg1 : i32, i32, i32
  }
  func.func @transform_1(%arg0: i32, %arg1: i32) -> (i32, i32, i32) {
    %c0_i32 = arith.constant 0 : i32
    %c0_i32_0 = arith.constant 0 : i32
    return %arg0, %c0_i32, %arg1 : i32, i32, i32
  }
}

</mosaic_0001>

<bundles_post_ra>
// kernel: tpu_custom_call.1
= control target key start
LH: loop header
LB: loop body
LE: loop exit
PB: predicated region body
PF: predicated region fallthrough
CT: control target
= control target key end

     0   :  { %6 = vsyncpa [#allocation3], 0  ;;  %s688_s0 = inlined_call_operand.hbm [shape: f32[2,4,256], index: 0, kind: input, shape index: {}]   ;;  %s689_s1 = inlined_call_operand.hbm [shape: f32[2,4,256], index: 1, kind: output, shape index: {}]  }
   0x1   :  { %8 = vsyncpa [#allocation3 + $0x1], 0 }
   0x2   :  { %9 = vsyncpa [#allocation4], 0 }
   0x3   :  { %11 = vsyncpa [#allocation4 + $0x1], 0  ;;  %s551_s6 = smov 0   ;;  %s553_s7 = smov 0  }
   0x4   :  { %s555_s8 = smov 0   ;;  %s557_s9 = smov 0  }
   0x5   :  { %s559_s10 = smov 0   ;;  %s561_s11 = smov 0  }
   0x6 LB: > { %s334_s12 = sadd.s32 4294967295, %s538_s11   ;;  %s335_s13 = sadd.s32 4294967294, %s538_s11   ;;  %s538_s11 = sphi %s561_s11, %s17_s11   ;;  %s534_s10 = sphi %s559_s10, %s700_s10   ;;  %s530_s9 = sphi %s557_s9, %s699_s9   ;;  %s526_s8 = sphi %s555_s8, %s698_s8   ;;  %s522_s7 = sphi %s553_s7, %s697_s7   ;;  %s518_s6 = sphi %s551_s6, %s696_s6  }
   0x7   : > { %s29_s14 = sadd.s32 1, %s534_s10  ;;  %s38_s15 = sadd.s32 1, %s526_s8 }
   0x8   : > { %p31_p0 = scmp.ge.s32.totalorder %s29_s14, 2  ;;  %p45_p1 = scmp.ne.s32.totalorder %s526_s8, %s522_s7 }
   0x9   : > { %p46_p2 = scmp.eq.s32.totalorder %s538_s11, 0  ;;  %p51_p3 = scmp.ne.s32.totalorder %s522_s7, %s518_s6 }
   0xa   : > { %s702_s14 = smov (%p31_p0, %s29_s14), 0  ;;  %p52_p5 = scmp.eq.s32.totalorder %s334_s12, 0 }
   0xb   : > { %p592_p4 = por %p46_p2, %p45_p1  ;;  %s33_s17 = ssub.s32 %s534_s10, %s702_s14 }
   0xc   : > { %p77_p6 = scmp.eq.s32.totalorder %s334_s12, 1  ;;  %p36_p7 = scmp.eq.s32.totalorder %s33_s17, 0 }
   0xd   : > { %p598_p8 = por %p52_p5, %p51_p3  ;;  %p83_p10 = scmp.eq.s32.totalorder %s335_s13, 1 }
   0xe   : > { %p602_p9 = por %p77_p6, %p45_p1  ;;  %p337_p12 = scmp.ge.s32.totalorder %s538_s11, 2 }
   0xf   : > { %s607_s20 = scalar_select %p36_p7, %s526_s8, %s38_s15  }
  0x10   : > { %p609_p11 = por %p83_p10, %p51_p3  ;;  %p365_p13 = scmp.lt.s32.totalorder %s538_s11, 2 }
  0x11   : > { %s103_s22 = sand.u32 1, %s526_s8   ;;  %s351_s24 = sshll.u32 %s534_s10, 3 }
  0x12   : > { %s338_s23 = sshll.u32 %s103_s22, 3  ;;  %s114_s27 = scalar_lea.hbm %s688_s0, %s351_s24 }
  0x13   : > { %s107_s28 = scalar_lea.vmem [#allocation2], %s338_s23  ;;  %s116_s30 = sshll.u32 %s114_s27, 4  ;;  %s117_s30 = int_to_ptr.hbm [resolvable:$true] %s116_s30 }
  0x14   : > { %s118_s29 = sshll.u32 %s107_s28, 4  ;;  %p358_p0 = pnand %p365_p13, %p592_p4  ;;  %s119_s29 = int_to_ptr.vmem [resolvable:$true] %s118_s29 }
  0x15   : > { %p341_p1 = scmp.ge.s32.totalorder %s538_s11, 1  ;;  %p123_p2 = scmp.lt.s32.totalorder %s538_s11, 3 }
  0x16   : > { %s104_s2 = scalar_lea.sflag [#allocation3], %s103_s22 }
  0x17   : > { %360 = dma.hbm_to_vmem [thread:$0]  (!%p358_p0), %s117_s30, 128, %s119_s29, %s104_s2  }
  0x18   : > { %p124_p3 = pnand %p341_p1, %p123_p2 }
  0x19   : > { %s625_s3 = sand.u32 (!%p124_p3), 1, %s522_s7  }
  0x1a   : > { %127 = sbr.rel (%p124_p3) target bundleno = 93 (0x5d), region = 24  ;;  %s342_s4 = sshll.u32 (!%p124_p3), %s625_s3, 3 }
  0x1b   : > { %s130_s5 = scalar_lea.sflag (!%p124_p3), [#allocation3], %s625_s3  ;;  %s133_s12 = scalar_lea.vmem (!%p124_p3), [#allocation2], %s342_s4 }
  0x1f   : > { %509 = dma.done.wait (%p598_p8), %s130_s5, 128  }
  0x20   : > { %511 = vsyncadd (%p598_p8), %s130_s5, 4294967168  ;;  %v540_v0 = vmov 4.0   ;;  %v635_v2 = vld [vmem:[%s133_s12] sm:$0xff]  ;;  %vm162_vm0 = vcmask 1043456   ;;  %s352_s13 = sshll.u32 %s530_s9, 3  ;;  %s152_s9 = scalar_lea.vmem [#allocation5], %s342_s4 }
  0x21   : > { %416 = vrcp.f32 %v540_v0  ;;  %157 = vst [vmem:[#allocation1] ss:$2 sm:$0xff] %v635_v2  ;;  %s245_s17 = scalar_lea.hbm %s689_s1, %s352_s13  ;;  %s247_s18 = sshll.u32 %s152_s9, 4  ;;  %s248_s18 = int_to_ptr.vmem [resolvable:$true] %s247_s18 }
  0x22   : > { %s249_s22 = sshll.u32 %s245_s17, 4  ;;  %s232_s23 = scalar_lea.sflag [#allocation4], %s625_s3  ;;  %s250_s22 = int_to_ptr.hbm [resolvable:$true] %s249_s22 }
  0x23   : > { %s470_s24 = sshra.s32 %s250_s22, 4  ;;  %s476_s28 = scalar_lea.hbm %s689_s1, 16  ;;  %s471_s24 = int_to_ptr.hbm [resolvable:$true] %s470_s24 }
  0x24   : > { %s472_s25 = scalar_lea.hbm %s471_s24, 8  ;;  %p477_p7 = scmp.lt.s32.totalorder %s471_s24, %s689_s1 }
  0x25   : > { %p473_p4 = scmp.ne.s32.totalorder %s471_s24, %s472_s25  ;;  %p478_p8 = scmp.lt.s32.totalorder %s476_s28, %s472_s25 }
  0x27   : > { %v417_v1 = vpop.eup %416  ;;  %p474_p5 = pnand %p473_p4, %p602_p9  ;;  %p479_p10 = por %p478_p8, %p477_p7 }
  0x28   : > { %v178_v3 = vmul.f32 4.0, %v417_v1  ;;  %v158_v5 = vld.sshfl [vmem:[#allocation1] sm:$0xff pattern:$0x75316420]  ;;  %vm182_vm1 = vweird.f32 %v417_v1 }
  0x29   : > { %v159_v6 = vld.sshfl [vmem:[#allocation1 + $0x8] sm:$0xff pattern:$0x75316420]  ;;  %v163_v7 = vsel %vm162_vm0, %v158_v5, 0.0  ;;  %p475_p6 = pneg %p474_p5 }
  0x2a   : > { %v179_v4 = vsub.f32 1.0, %v178_v3  ;;  %v170_v8 = vsel %vm162_vm0, %v159_v6, 0.0  ;;  %v164_v9 = vrot.slane %v163_v7, 4 }
  0x2b   : > { %v171_v10 = vrot.slane %v170_v8, 4  ;;  %p480_p13 = pnand %p479_p10, %p475_p6 }
  0x2c   : > { %v180_v11 = vmul.f32 %v417_v1, %v179_v4  ;;  %v165_v12 = vadd.f32 %v164_v9, %v163_v7 }
  0x2d   : > { %v172_v13 = vadd.f32 %v171_v10, %v170_v8 }
  0x2e   : > { %v166_v14 = vrot.slane %v165_v12, 2  ;;  %v181_v16 = vadd.f32 %v417_v1, %v180_v11 }
  0x2f   : > { %v173_v15 = vrot.slane %v172_v13, 2 }
  0x30   : > { %v167_v17 = vadd.f32 %v166_v14, %v165_v12  ;;  %v183_v21 = vsel %vm182_vm1, %v417_v1, %v181_v16 }
  0x31   : > { %v174_v18 = vadd.f32 %v173_v15, %v172_v13 }
  0x32   : > { %v168_v19 = vrot.slane %v167_v17, 1 }
  0x33   : > { %v175_v20 = vrot.slane %v174_v18, 1 }
  0x34   : > { %v169_v22 = vadd.f32 %v168_v19, %v167_v17 }
  0x35   : > { %v176_v23 = vadd.f32 %v175_v20, %v174_v18 }
  0x36   : > { %v184_v24 = vmul.f32 %v183_v21, %v169_v22 }
  0x37   : > { %v185_v25 = vmul.f32 %v183_v21, %v176_v23 }
  0x38   : > { %v344_v26 = vmul.f32 -1.442695, %v184_v24 }
  0x39   : > { %v345_v27 = vmul.f32 -1.442695, %v185_v25 }
  0x3a   : > { %418 = vpow2.f32 %v344_v26 }
  0x3b   : > { %420 = vpow2.f32 %v345_v27 }
  0x40   : > { %v419_v28 = vpop.eup %418 }
  0x41   : > { %v421_v29 = vpop.eup %420  ;;  %v192_v30 = vadd.f32 1.0, %v419_v28 }
  0x42   : > { %v193_v31 = vadd.f32 1.0, %v421_v29 }
  0x43   : > { %422 = vrcp.f32 %v192_v30  ;;  %vm199_vm4 = vweird.f32 %v192_v30  ;;  %v205_v43 = vand.u32 2147483648, %v192_v30  ;;  %v203_v45 = vand.u32 2147483647, %v192_v30 }
  0x44   : > { %424 = vrcp.f32 %v193_v31  ;;  %v220_v39 = vand.u32 2147483648, %v193_v31  ;;  %v218_v41 = vand.u32 2147483647, %v193_v31  ;;  %vm214_vm6 = vweird.f32 %v193_v31 }
  0x45   : > { %v206_v50 = vor.u32 1.1754944e-38, %v205_v43  ;;  %vm204_vm9 = vcmp.eq.f32.partialorder %v203_v45, 8.507059e+37 }
  0x46   : > { %v221_v47 = vor.u32 1.1754944e-38, %v220_v39  ;;  %vm219_vm8 = vcmp.eq.f32.partialorder %v218_v41, 8.507059e+37 }
  0x49   : > { %v423_v32 = vpop.eup %422 }
  0x4a   : > { %v425_v33 = vpop.eup %424  ;;  %v195_v34 = vmul.f32 %v423_v32, %v192_v30  ;;  %vm200_vm2 = vweird.f32 %v423_v32 }
  0x4b   : > { %v210_v35 = vmul.f32 %v425_v33, %v193_v31  ;;  %vm215_vm3 = vweird.f32 %v425_v33  ;;  %vm641_vm5 = vmor %vm199_vm4, %vm200_vm2 }
  0x4c   : > { %v196_v36 = vsub.f32 1.0, %v195_v34  ;;  %vm216_vm7 = vmor %vm214_vm6, %vm215_vm3 }
  0x4d   : > { %v211_v37 = vsub.f32 1.0, %v210_v35 }
  0x4e   : > { %v197_v38 = vmul.f32 %v423_v32, %v196_v36 }
  0x4f   : > { %v212_v40 = vmul.f32 %v425_v33, %v211_v37 }
  0x50   : > { %v198_v42 = vadd.f32 %v423_v32, %v197_v38 }
  0x51   : > { %v213_v46 = vadd.f32 %v425_v33, %v212_v40 }
  0x52   : > { %v202_v48 = vsel %vm641_vm5, %v423_v32, %v198_v42 }
  0x53   : > { %v217_v49 = vsel %vm216_vm7, %v425_v33, %v213_v46  ;;  %v207_v53 = vsel %vm204_vm9, %v206_v50, %v202_v48 }
  0x54   : > { %v222_v51 = vsel %vm219_vm8, %v221_v47, %v217_v49 }
  0x55   : > { %v226_v52 = vrot.slane %v222_v51, 4 }
  0x57   : > { %v227_v54 = vsel %vm162_vm0, %v207_v53, %v226_v52 }
  0x58   : > { %v229_v55 = vmul.f32 %v227_v54, %v635_v2 }
  0x5a   : > { %230 = vst [vmem:[%s152_s9] sm:$0xff] %v229_v55 }
  0x5b   : > { %483 = shalt.err (!%p480_p13)
}
  0x5c   : > { %355 = dma.vmem_to_hbm [thread:$0]  (%p602_p9), %s248_s18, 128, %s250_s22, %s232_s23  }
  0x5d PF: > { %s261_s2 = sand.u32 1, %s518_s6   ;;  %p362_p0 = pnand %p337_p12, %p609_p11 }
  0x5e   : > { %s262_s3 = scalar_lea.sflag [#allocation4], %s261_s2 }
  0x5f   : > { %p363_p1 = pneg %p362_p0 }
  0x61   : > { %513 = dma.done.wait (%p363_p1), %s262_s3, 128  }
  0x62   : > { %515 = vsyncadd (%p363_p1), %s262_s3, 4294967168  ;;  %s17_s11 = sadd.s32 1, %s538_s11   ;;  %s696_s6 = smov %s522_s7 }
  0x63   : > { %p14_p2 = scmp.ge.s32.totalorder %s17_s11, 4   ;;  %s697_s7 = smov %s526_s8 }
  0x64   : > { %s698_s8 = smov %s607_s20  ;;  %s699_s9 = smov %s534_s10 }
  0x65   : > { %s700_s10 = smov %s702_s14  ;;  %16 = sbr.rel (!%p14_p2) target bundleno = 6 (0x6), region = 69 }
  0x6a   :  { %268 = vsyncpa [#allocation3], 1 }
  0x6b   :  { %270 = vsyncpa [#allocation3 + $0x1], 1 }
  0x6c   :  { %271 = vsyncpa [#allocation4], 1 }
  0x6d   :  { %273 = vsyncpa [#allocation4 + $0x1], 1 }

</bundles_post_ra>
